<compile_context>
chip_gen: v7x
topology: tpu7x:2x2x1
jax: 0.10.0
libtpu: 0.0.40
codegen_flags: <defaults>
</compile_context>

<pallas_src>
import jax
import jax.numpy as jnp
from jax import lax
from jax.experimental import pallas as pl
from jax.experimental.pallas import tpu as pltpu


# ---------------------------------------------------------------------------
# Fused GEMM + per-channel affine + activation (+ residual) Pallas kernel.
# ---------------------------------------------------------------------------
def _make_kernel(act, has_residual):
    def _activate(y):
        if act == "relu":
            return jnp.maximum(y, 0.0)
        if act == "tanh":
            return jnp.tanh(y)
        return y

    if has_residual:
        def kernel(x_ref, w_ref, s_ref, t_ref, r_ref, o_ref):
            y = jnp.dot(x_ref[0], w_ref[...], preferred_element_type=jnp.float32)
            y = y * s_ref[...] + t_ref[...]
            o_ref[0] = _activate(y) + r_ref[0]
    else:
        def kernel(x_ref, w_ref, s_ref, t_ref, o_ref):
            y = jnp.dot(x_ref[0], w_ref[...], preferred_element_type=jnp.float32)
            y = y * s_ref[...] + t_ref[...]
            o_ref[0] = _activate(y)
    return kernel


def _pick_tile(n, cap=256):
    """Largest tile <= cap dividing n (n is a multiple of 8 for all layers here)."""
    if n <= cap:
        return n
    t = cap
    while t > 8 and n % t != 0:
        t //= 2
    return t if n % t == 0 else n


def fused_gemm(x, w, scale, shift, residual=None, act=None):
    """out[b,n,:] = act((x[b,n,:] @ w) * scale + shift) (+ residual[b,n,:])."""
    B, N, K = x.shape
    Cout = w.shape[1]
    tn = _pick_tile(N)
    grid = (B, N // tn)

    x_spec = pl.BlockSpec((1, tn, K), lambda b, n: (b, n, 0))
    w_spec = pl.BlockSpec((K, Cout), lambda b, n: (0, 0))
    vec_spec = pl.BlockSpec((1, Cout), lambda b, n: (0, 0))
    out_spec = pl.BlockSpec((1, tn, Cout), lambda b, n: (b, n, 0))

    in_specs = [x_spec, w_spec, vec_spec, vec_spec]
    args = [x.astype(jnp.float32), w.astype(jnp.float32),
            scale.reshape(1, Cout).astype(jnp.float32),
            shift.reshape(1, Cout).astype(jnp.float32)]
    if residual is not None:
        in_specs.append(pl.BlockSpec((1, tn, Cout), lambda b, n: (b, n, 0)))
        args.append(residual.astype(jnp.float32))

    return pl.pallas_call(
        _make_kernel(act, residual is not None),
        out_shape=jax.ShapeDtypeStruct((B, N, Cout), jnp.float32),
        grid_spec=pltpu.PrefetchScalarGridSpec(
            num_scalar_prefetch=0,
            grid=grid,
            in_specs=in_specs,
            out_specs=out_spec,
        ),
        compiler_params=pltpu.CompilerParams(
            dimension_semantics=("parallel", "parallel")),
    )(*args)


# ---------------------------------------------------------------------------
# Layout / weight-packing helpers (pure JAX, wrapper side).
# ---------------------------------------------------------------------------
def im2col(x_nhwc, kh, kw):
    """(B, H, W, C) (already padded) -> (B, Ho*Wo, kh*kw*C); taps outer, channels inner."""
    B, H, W, C = x_nhwc.shape
    Ho, Wo = H - kh + 1, W - kw + 1
    cols = []
    for dy in range(kh):
        for dx in range(kw):
            cols.append(x_nhwc[:, dy:dy + Ho, dx:dx + Wo, :].reshape(B, Ho * Wo, C))
    return jnp.concatenate(cols, axis=-1)


def conv_w_to_mat(w):
    """PyTorch Conv2d weight (Cout, Cin, kh, kw) -> GEMM weight (kh*kw*Cin, Cout)."""
    Cout, Cin, kh, kw = w.shape
    return jnp.transpose(w, (2, 3, 1, 0)).reshape(kh * kw * Cin, Cout)


def bn_fold(gamma, beta, mean, var, eps=1e-5):
    s = gamma / jnp.sqrt(var + eps)
    return s, beta - mean * s


def convtranspose_gemm_weight(wt):
    """PyTorch ConvTranspose2d weight (Cin, Cout, 3, 3) [stride 2, pad 1, out_pad 1]
    -> (4*Cin, 4*Cout) GEMM weight producing all 4 output parities at once.
    Row taps: [x(m,n), x(m,n+1), x(m+1,n), x(m+1,n+1)];
    Col blocks (parities): [(even,even), (even,odd), (odd,even), (odd,odd)]."""
    Cin, Cout = wt.shape[0], wt.shape[1]
    z = jnp.zeros((Cin, Cout), wt.dtype)
    g = lambda a, b: wt[:, :, a, b]
    cols = [
        jnp.concatenate([g(1, 1), z,       z,       z      ], axis=0),
        jnp.concatenate([g(1, 2), g(1, 0), z,       z      ], axis=0),
        jnp.concatenate([g(2, 1), z,       g(0, 1), z      ], axis=0),
        jnp.concatenate([g(2, 2), g(2, 0), g(0, 2), g(0, 0)], axis=0),
    ]
    return jnp.concatenate(cols, axis=1)


# ---------------------------------------------------------------------------
# Decoder built from the fused kernel.
# ---------------------------------------------------------------------------
def resnet_block(x_nhwc, p, eps=1e-5):
    B, H, W, C = x_nhwc.shape
    s1, t1 = bn_fold(*p["bn1"], eps)
    xp = jnp.pad(x_nhwc, ((0, 0), (1, 1), (1, 1), (0, 0)), mode="reflect")
    h = fused_gemm(im2col(xp, 3, 3), conv_w_to_mat(p["w1"]), s1, t1, act="relu")
    h = h.reshape(B, H, W, C)

    s2, t2 = bn_fold(*p["bn2"], eps)
    hp = jnp.pad(h, ((0, 0), (1, 1), (1, 1), (0, 0)), mode="reflect")
    out = fused_gemm(im2col(hp, 3, 3), conv_w_to_mat(p["w2"]), s2, t2,
                     residual=x_nhwc.reshape(B, H * W, C), act=None)
    return out.reshape(B, H, W, C)


def upsample_block(x_nhwc, wt, bn, eps=1e-5):
    B, H, W, Cin = x_nhwc.shape
    Cout = wt.shape[1]
    xz = jnp.pad(x_nhwc, ((0, 0), (0, 1), (0, 1), (0, 0)))        # zero pad bottom/right
    taps = im2col(xz, 2, 2)                                        # (B, H*W, 4*Cin)
    wbig = convtranspose_gemm_weight(wt)                           # (4*Cin, 4*Cout)
    s, t = bn_fold(*bn, eps)
    o4 = fused_gemm(taps, wbig, jnp.tile(s, 4), jnp.tile(t, 4), act="relu")
    o = o4.reshape(B, H, W, 2, 2, Cout)                            # (B, m, n, a, b, c)
    o = jnp.transpose(o, (0, 1, 3, 2, 4, 5)).reshape(B, 2 * H, 2 * W, Cout)
    return o


def final_layer(x_nhwc, w7, b7):
    B, H, W, Cin = x_nhwc.shape
    xp = jnp.pad(x_nhwc, ((0, 0), (3, 3), (3, 3), (0, 0)), mode="reflect")
    cols = im2col(xp, 7, 7)                                        # (B, H*W, 49*Cin)
    o = fused_gemm(cols, conv_w_to_mat(w7), jnp.ones((1,), jnp.float32), b7, act="tanh")
    return o.reshape(B, H, W, 1)


def ftgan_decoder_pallas(x_nchw, params, eps=1e-5):
    x = jnp.transpose(x_nchw, (0, 2, 3, 1)).astype(jnp.float32)    # NCHW -> NHWC
    for blk in params["blocks"]:
        x = resnet_block(x, blk, eps)
    for up in params["ups"]:
        x = upsample_block(x, up["wt"], up["bn"], eps)
    y = final_layer(x, params["w7"], params["b7"])
    return jnp.transpose(y, (0, 3, 1, 2))                          # NHWC -> NCHW


# ---------------------------------------------------------------------------
# Pure-JAX reference (lax convolutions), mirroring the PyTorch forward.
# ---------------------------------------------------------------------------
def ftgan_decoder_reference(x, params, eps=1e-5):
    dn = ("NCHW", "OIHW", "NCHW")
    hp = lax.Precision.HIGHEST

    def bn(v, g, b, m, var):
        s = g / jnp.sqrt(var + eps)
        return v * s[None, :, None, None] + (b - m * s)[None, :, None, None]

    y = x.astype(jnp.float32)
    for blk in params["blocks"]:
        h = jnp.pad(y, ((0, 0), (0, 0), (1, 1), (1, 1)), mode="reflect")
        h = lax.conv_general_dilated(h, blk["w1"], (1, 1), "VALID",
                                     dimension_numbers=dn, precision=hp)
        h = jax.nn.relu(bn(h, *blk["bn1"]))
        h = jnp.pad(h, ((0, 0), (0, 0), (1, 1), (1, 1)), mode="reflect")
        h = lax.conv_general_dilated(h, blk["w2"], (1, 1), "VALID",
                                     dimension_numbers=dn, precision=hp)
        y = y + bn(h, *blk["bn2"])
    for up in params["ups"]:
        rhs = jnp.flip(up["wt"], axis=(2, 3))   # ConvTranspose == lhs-dilated conv, flipped kernel
        h = lax.conv_general_dilated(y, rhs, (1, 1), [(1, 2), (1, 2)],
                                     lhs_dilation=(2, 2),
                                     dimension_numbers=("NCHW", "IOHW", "NCHW"),
                                     precision=hp)
        y = jax.nn.relu(bn(h, *up["bn"]))
    y = jnp.pad(y, ((0, 0), (0, 0), (3, 3), (3, 3)), mode="reflect")
    y = lax.conv_general_dilated(y, params["w7"], (1, 1), "VALID",
                                 dimension_numbers=dn, precision=hp)
    y = y + params["b7"][None, :, None, None]
    return jnp.tanh(y)


if __name__ == "__main__":
    key = jax.random.PRNGKey(0)
    B, ngf, n_blocks, H, W = 2, 16, 2, 8, 8      # small but structure-faithful config
    C = ngf * 8                                   # 128 channels in the resnet stage

    keys = iter(jax.random.split(key, 64))

    def nrm(shape, scale):
        return scale * jax.random.normal(next(keys), shape, jnp.float32)

    def bn_params(c):
        gamma = 1.0 + 0.1 * jax.random.normal(next(keys), (c,), jnp.float32)
        beta = 0.1 * jax.random.normal(next(keys), (c,), jnp.float32)
        mean = 0.1 * jax.random.normal(next(keys), (c,), jnp.float32)
        var = jax.random.uniform(next(keys), (c,), jnp.float32, 0.5, 1.5)
        return (gamma, beta, mean, var)

    params = {"blocks": [], "ups": []}
    for _ in range(n_blocks):
        params["blocks"].append({
            "w1": nrm((C, C, 3, 3), 1.0 / (3.0 * C ** 0.5)),
            "bn1": bn_params(C),
            "w2": nrm((C, C, 3, 3), 1.0 / (3.0 * C ** 0.5)),
            "bn2": bn_params(C),
        })
    cin = C
    for _ in range(2):
        cout = cin // 2
        params["ups"].append({
            "wt": nrm((cin, cout, 3, 3), 1.0 / (3.0 * cin ** 0.5)),   # ConvTranspose2d layout
            "bn": bn_params(cout),
        })
        cin = cout
    params["w7"] = nrm((1, 2 * ngf, 7, 7), 1.0 / (7.0 * (2 * ngf) ** 0.5))
    params["b7"] = nrm((1,), 0.1)

    x = jax.random.normal(next(keys), (B, C, H, W), jnp.float32)

    out = ftgan_decoder_pallas(x, params)
    out = jax.block_until_ready(out)
    ref = ftgan_decoder_reference(x, params)

    assert out.shape == (B, 1, 4 * H, 4 * W), out.shape
    max_err = float(jnp.max(jnp.abs(out - ref)))
    assert jnp.allclose(out, ref, atol=2e-3, rtol=2e-3), f"mismatch vs reference: {max_err}"

    print("KERNEL_OK")
</pallas_src>

<mosaic_0001>
module attributes {stable_mosaic.version = 11 : i64} {
  func.func @kernel(%arg0: i32, %arg1: i32, %arg2: memref<1x64x1152xf32, #tpu.memory_space<vmem>>, %arg3: memref<1152x128xf32, #tpu.memory_space<vmem>>, %arg4: memref<1x128xf32, #tpu.memory_space<vmem>>, %arg5: memref<1x128xf32, #tpu.memory_space<vmem>>, %arg6: memref<1x64x128xf32, #tpu.memory_space<vmem>>) attributes {dimension_semantics = [#tpu.dimension_semantics<parallel>, #tpu.dimension_semantics<parallel>], iteration_bounds = array<i64: 2, 1>, scalar_prefetch = 0 : i64, scratch_operands = 0 : i64, tpu.core_type = #tpu.core_type<tc>, window_params = [{transform_indices = @transform_0, window_bounds = array<i64: 1, 64, 1152>}, {pipeline_mode = #tpu.pipeline_mode<synchronous>, transform_indices = @transform_1, window_bounds = array<i64: 1152, 128>}, {pipeline_mode = #tpu.pipeline_mode<synchronous>, transform_indices = @transform_2, window_bounds = array<i64: 1, 128>}, {pipeline_mode = #tpu.pipeline_mode<synchronous>, transform_indices = @transform_3, window_bounds = array<i64: 1, 128>}, {transform_indices = @transform_4, window_bounds = array<i64: 1, 64, 128>}]} {
    %c0 = arith.constant 0 : index
    %c0_0 = arith.constant 0 : index
    %c0_1 = arith.constant 0 : index
    %0 = vector.load %arg2[%c0, %c0_0, %c0_1] : memref<1x64x1152xf32, #tpu.memory_space<vmem>>, vector<1x64x1152xf32>
    %1 = vector.shape_cast %0 : vector<1x64x1152xf32> to vector<64x1152xf32>
    %c0_2 = arith.constant 0 : index
    %c0_3 = arith.constant 0 : index
    %2 = vector.load %arg3[%c0_2, %c0_3] : memref<1152x128xf32, #tpu.memory_space<vmem>>, vector<1152x128xf32>
    %cst = arith.constant dense<0.000000e+00> : vector<64x128xf32>
    %3 = tpu.matmul %1, %2, %cst {dimension_numbers = #tpu.dot_dimension_numbers<[1], [0], [0], [1], [0, 0, 1, 1], [], []>} : vector<64x1152xf32>, vector<1152x128xf32>, vector<64x128xf32> -> vector<64x128xf32>
    %c0_4 = arith.constant 0 : index
    %c0_5 = arith.constant 0 : index
    %4 = vector.load %arg4[%c0_4, %c0_5] : memref<1x128xf32, #tpu.memory_space<vmem>>, vector<1x128xf32>
    %5 = vector.broadcast %4 : vector<1x128xf32> to vector<64x128xf32>
    %6 = arith.mulf %3, %5 : vector<64x128xf32>
    %c0_6 = arith.constant 0 : index
    %c0_7 = arith.constant 0 : index
    %7 = vector.load %arg5[%c0_6, %c0_7] : memref<1x128xf32, #tpu.memory_space<vmem>>, vector<1x128xf32>
    %8 = vector.broadcast %7 : vector<1x128xf32> to vector<64x128xf32>
    %9 = arith.addf %6, %8 : vector<64x128xf32>
    %cst_8 = arith.constant 0.000000e+00 : f32
    %10 = vector.broadcast %cst_8 : f32 to vector<64x128xf32>
    %11 = arith.maximumf %9, %10 : vector<64x128xf32>
    %c0_9 = arith.constant 0 : index
    %c0_10 = arith.constant 0 : index
    %c0_11 = arith.constant 0 : index
    %12 = vector.load %arg6[%c0_9, %c0_10, %c0_11] : memref<1x64x128xf32, #tpu.memory_space<vmem>>, vector<1x64x128xf32>
    %13 = vector.shape_cast %12 : vector<1x64x128xf32> to vector<64x128xf32>
    %14 = vector.shape_cast %11 : vector<64x128xf32> to vector<1x64x128xf32>
    tpu.vector_store %arg6[%c0_9, %c0_10, %c0_11], %14 {strides = array<i32>} : memref<1x64x128xf32, #tpu.memory_space<vmem>>, vector<1x64x128xf32>,
    return
  }
  func.func @transform_0(%arg0: i32, %arg1: i32) -> (i32, i32, i32) {
    %c0_i32 = arith.constant 0 : i32
    %c0_i32_0 = arith.constant 0 : i32
    return %arg0, %arg1, %c0_i32 : i32, i32, i32
  }
  func.func @transform_1(%arg0: i32, %arg1: i32) -> (i32, i32) {
    %c0_i32 = arith.constant 0 : i32
    %c0_i32_0 = arith.constant 0 : i32
    %c0_i32_1 = arith.constant 0 : i32
    return %c0_i32, %c0_i32_0 : i32, i32
  }
  func.func @transform_2(%arg0: i32, %arg1: i32) -> (i32, i32) {
    %c0_i32 = arith.constant 0 : i32
    %c0_i32_0 = arith.constant 0 : i32
    %c0_i32_1 = arith.constant 0 : i32
    return %c0_i32, %c0_i32_0 : i32, i32
  }
  func.func @transform_3(%arg0: i32, %arg1: i32) -> (i32, i32) {
    %c0_i32 = arith.constant 0 : i32
    %c0_i32_0 = arith.constant 0 : i32
    %c0_i32_1 = arith.constant 0 : i32
    return %c0_i32, %c0_i32_0 : i32, i32
  }
  func.func @transform_4(%arg0: i32, %arg1: i32) -> (i32, i32, i32) {
    %c0_i32 = arith.constant 0 : i32
    %c0_i32_0 = arith.constant 0 : i32
    return %arg0, %arg1, %c0_i32 : i32, i32, i32
  }
}

</mosaic_0001>

<bundles_post_ra>
// kernel: tpu_custom_call.1
= control target key start
LH: loop header
LB: loop body
LE: loop exit
PB: predicated region body
PF: predicated region fallthrough
CT: control target
= control target key end

     0   :  { %9 = vsyncpa [#allocation3], 0  ;;  %s2193_s0 = inlined_call_operand.hbm [shape: f32[2,64,1152], index: 0, kind: input, shape index: {}]   ;;  %s2194_s1 = inlined_call_operand.hbm [shape: f32[1152,128], index: 1, kind: input, shape index: {}]   ;;  %s2195_s2 = inlined_call_operand.vmem [shape: f32[1,128], index: 2, kind: input, shape index: {}]   ;;  %s2196_s3 = inlined_call_operand.vmem [shape: f32[1,128], index: 3, kind: input, shape index: {}]   ;;  %s2197_s4 = inlined_call_operand.hbm [shape: f32[2,64,128], index: 4, kind: output, shape index: {}]  }
   0x1   :  { %11 = vsyncpa [#allocation3 + $0x1], 0 }
   0x2   :  { %12 = vsyncpa [#allocation6], 0 }
   0x3   :  { %13 = vsyncpa [#allocation4], 0 }
   0x4   :  { %15 = vsyncpa [#allocation4 + $0x1], 0  ;;  %s1899_s15 = smov 0   ;;  %s1901_s16 = smov 0  }
   0x5   :  { %s1903_s17 = smov 0   ;;  %s1905_s18 = smov 0  }
   0x6   :  { %s1907_s19 = smov 0   ;;  %s1909_s20 = smov 0  }
   0x7 LB: > { %s1152_s21 = sadd.s32 4294967295, %s1863_s20   ;;  %s1153_s22 = sadd.s32 4294967294, %s1863_s20   ;;  %s1863_s20 = sphi %s1909_s20, %s21_s20   ;;  %s1859_s19 = sphi %s1907_s19, %s2220_s19   ;;  %s1855_s18 = sphi %s1905_s18, %s2219_s18   ;;  %s1851_s17 = sphi %s1903_s17, %s2218_s17   ;;  %s1847_s16 = sphi %s1901_s16, %s2217_s16   ;;  %s1843_s15 = sphi %s1899_s15, %s2216_s15  }
   0x8   : > { %p55_p0 = scmp.ne.s32.totalorder %s1847_s16, %s1843_s15  ;;  %p1933_p1 = scmp.eq.s32.totalorder %s1152_s21, 0 }
   0x9   : > { %p1937_p2 = scmp.eq.s32.totalorder %s1152_s21, 1  ;;  %p150_p3 = scmp.eq.s32.totalorder %s1153_s22, 1 }
   0xa   : > { %s2202_s23 = scalar_select %p1933_p1, 1, 0 }
   0xb   : > { %s2203_s24 = scalar_select %p1937_p2, 1, 0 }
   0xc   : > { %p1943_p4 = por %p1933_p1, %p55_p0  ;;  %p1154_p5 = scmp.ge.s32.totalorder %s1863_s20, 1 }
   0xd   : > { %p1948_p6 = por %p150_p3, %p55_p0  ;;  %p157_p7 = scmp.lt.s32.totalorder %s1863_s20, 3 }
   0xe   : > { %s2204_s25 = scalar_select %p1943_p4, 1, 0 }
   0xf   : > { %s2205_s26 = scalar_select %p1948_p6, 1, 0 }
  0x10   : > { %p1953_p8 = pnand %p1154_p5, %p157_p7  ;;  %s1865_s28 = smov [#allocation5]  }
  0x11   : > { %s169_s29 = sshll.u32 %s1865_s28, 4  ;;  %s33_s5 = sadd.s32 1, %s1859_s19  ;;  %s170_s29 = int_to_ptr.vmem [resolvable:$true] %s169_s29 }
  0x12   : > { %s2206_s27 = scalar_select %p1953_p8, 1, 0 }
  0x13   : > { %p1648_p9 = pneg %p1953_p8  ;;  %s1719_s8 = scalar_lea.hbm %s2194_s1, 18432 }
  0x14   : > { %p1720_p12 = scmp.ne.s32.totalorder %s2194_s1, %s1719_s8  ;;  %p1726_p5 = scmp.lt.u32.totalorder %s1719_s8, %s2194_s1 }
  0x15   : > { %p1962_p11 = pnand %p1648_p9, %p1933_p1 }
  0x17   : > { %p1721_p13 = pneg %p1962_p11 }
  0x19   : > { %p1722_p0 = pnand %p1721_p13, %p1720_p12 }
  0x1b   : > { %p1723_p3 = pneg %p1722_p0 }
  0x1d   : > { %p1728_p7 = pnand %p1726_p5, %p1723_p3 }
  0x1f   : > { %1731 = shalt.err (!%p1728_p7)
}
  0x20   : > { %s1732_s13 = scalar_lea.vmem %s170_s29, 18432  ;;  %p1740_p1 = scmp.lt.s32.totalorder %s170_s29, %s170_s29 }
  0x21   : > { %p1733_p9 = scmp.ne.s32.totalorder %s170_s29, %s1732_s13  ;;  %p1741_p4 = scmp.lt.s32.totalorder %s1732_s13, %s1732_s13 }
  0x23   : > { %p1735_p10 = pnand %p1733_p9, %p1721_p13  ;;  %p1742_p8 = por %p1741_p4, %p1740_p1 }
  0x25   : > { %p1736_p6 = pneg %p1735_p10 }
  0x27   : > { %p1743_p2 = pnand %p1742_p8, %p1736_p6 }
  0x29   : > { %1746 = shalt.err (!%p1743_p2)
}
  0x2a   : > { %s1866_s14 = smov 128   ;;  %s1867_s21 = smov 8  }
  0x2b   : > { %1651 = dma.hbm_to_vmem [thread:$0]  (!%p1962_p11), %s2194_s1, 18432, %s170_s29, [#allocation6], %s1866_s14, %s1866_s14, %s1867_s21  }
  0x2c   : > { %p35_p1 = scmp.ge.s32.totalorder %s33_s5, 2  ;;  %s42_s6 = sadd.s32 1, %s1851_s17 }
  0x2d   : > { %p49_p2 = scmp.ne.s32.totalorder %s1851_s17, %s1847_s16  ;;  %p50_p4 = scmp.eq.s32.totalorder %s1863_s20, 0 }
  0x2e   : > { %s2222_s5 = smov (%p35_p1, %s33_s5), 0  ;;  %p2208_p8 = scmp.ne.s32.totalorder %s2203_s24, 0 }
  0x2f   : > { %p51_p6 = por %p50_p4, %p49_p2  ;;  %s37_s8 = ssub.s32 %s1859_s19, %s2222_s5 }
  0x30   : > { %p1991_p10 = por %p2208_p8, %p49_p2  ;;  %p1661_p12 = scmp.lt.s32.totalorder %s1863_s20, 2 }
  0x31   : > { %p40_p13 = scmp.eq.s32.totalorder %s37_s8, 0  ;;  %s189_s30 = sand.u32 1, %s1851_s17  }
  0x32   : > { %s1637_s9 = smul.u32 576, %s189_s30  ;;  %p2003_p11 = pnand %p1661_p12, %p51_p6 }
  0x33   : > { %s2000_s10 = scalar_select %p40_p13, %s1851_s17, %s42_s6  }
  0x34   : > { %s1638_s29 = smul.u32 9216, %s1859_s19  ;;  %s193_s11 = scalar_lea.vmem [#allocation2], %s1637_s9 }
  0x35   : > { %s203_s12 = sshll.u32 %s193_s11, 4  ;;  %s2014_s22 = scalar_lea.sflag [#allocation3], %s189_s30  ;;  %s2012_s12 = int_to_ptr.vmem [resolvable:$true] %s203_s12 }
  0x36   : > { %s2010_s21 = scalar_lea.hbm %s2193_s0, %s1638_s29  ;;  %p1749_p3 = pneg %p2003_p11 }
  0x37   : > { %s1747_s28 = scalar_lea.hbm %s2010_s21, 9216  ;;  %s1752_s9 = scalar_lea.hbm %s2193_s0, 18432 }
  0x38   : > { %p1748_p0 = scmp.ne.s32.totalorder %s2010_s21, %s1747_s28  ;;  %p1753_p9 = scmp.lt.u32.totalorder %s2010_s21, %s2193_s0 }
  0x39   : > { %p1754_p1 = scmp.lt.u32.totalorder %s1752_s9, %s1747_s28  ;;  %p1756_p4 = scmp.lt.u32.totalorder %s1747_s28, %s2010_s21 }
  0x3a   : > { %p1750_p5 = pnand %p1749_p3, %p1748_p0 }
  0x3b   : > { %p1755_p2 = por %p1754_p1, %p1753_p9 }
  0x3c   : > { %p1751_p7 = pneg %p1750_p5 }
  0x3d   : > { %p1757_p6 = por %p1756_p4, %p1755_p2 }
  0x3f   : > { %p1758_p8 = pnand %p1757_p6, %p1751_p7 }
  0x41   : > { %1761 = shalt.err (!%p1758_p8)
}
  0x42   : > { %s1762_s30 = scalar_lea.vmem %s2012_s12, 9216  ;;  %s1868_s14 = smov [#allocation2]  }
  0x43   : > { %p1763_p12 = scmp.ne.s32.totalorder %s2012_s12, %s1762_s30  ;;  %s1767_s24 = sshll.u32 %s1868_s14, 4  ;;  %s1768_s24 = int_to_ptr.vmem [resolvable:$false] %s1767_s24 }
  0x44   : > { %s1769_s6 = scalar_lea.vmem %s1768_s24, 18432  ;;  %p1770_p5 = scmp.lt.s32.totalorder %s2012_s12, %s1768_s24 }
  0x45   : > { %p1765_p13 = pnand %p1763_p12, %p1749_p3  ;;  %p1771_p9 = scmp.lt.s32.totalorder %s1769_s6, %s1762_s30 }
  0x47   : > { %p1766_p0 = pneg %p1765_p13  ;;  %p1772_p1 = por %p1771_p9, %p1770_p5 }
  0x49   : > { %p1773_p2 = pnand %p1772_p1, %p1766_p0 }
  0x4b   : > { %1776 = shalt.err (!%p1773_p2)
}
  0x4c   : > { %s1869_s28 = smov 1152   ;;  %s1870_s8 = smov 72  }
  0x4d   : > { %1655 = dma.hbm_to_vmem [thread:$0]  (!%p2003_p11), %s2010_s21, 9216, %s2012_s12, %s2014_s22, %s1869_s28, %s1869_s28, %s1870_s8  }
  0x4e   : > { %p2211_p3 = scmp.ne.s32.totalorder %s2206_s27, 0 }
  0x4f   : > { %s2045_s9 = sand.u32 (!%p2211_p3), 1, %s1847_s16   ;;  %p2212_p7 = scmp.ne.s32.totalorder (!%p2211_p3), %s2204_s25, 0 }
  0x50   : > { %215 = sbr.rel (%p2211_p3) target bundleno = 432 (0x1b0), region = 36  ;;  %s218_s11 = scalar_lea.sflag (!%p2211_p3), [#allocation3], %s2045_s9 }
  0x51   : > { %s1639_s29 = smul.u32 (!%p2211_p3), 576, %s2045_s9 }
  0x53   : > { %s2049_s30 = scalar_lea.vmem (!%p2211_p3), [#allocation2], %s1639_s29 }
  0x57   : > { %1830 = dma.done.wait (%p2212_p7), %s218_s11, 9216  }
  0x58   : > { %1832 = vsyncadd (%p2212_p7), %s218_s11, 4294958080  ;;  %p2213_p11 = scmp.ne.s32.totalorder %s2202_s23, 0 }
  0x5a   : > { %1834 = dma.done.wait (%p2213_p11), [#allocation6], 18432  }
  0x5b   : > { %1836 = vsyncadd (%p2213_p11), [#allocation6], 4294948864  ;;  %v340_v0 = vld [vmem:[#allocation5 + $0x80] sm:$0xff]  ;;  %v341_v1 = vld [vmem:[#allocation5 + $0x88] sm:$0xff]  ;;  %s1160_s13 = sshll.u32 %s2045_s9, 6  ;;  %s1168_s22 = sshll.u32 %s1855_s18, 10 }
  0x5c   : > { %v372_v2 = vld [vmem:[#allocation5 + $0x180] sm:$0xff]  ;;  %v1461_v3 = vpack.c.bf16 %v341_v1, %v340_v0  ;;  %v373_v4 = vld [vmem:[#allocation5 + $0x188] sm:$0xff]  ;;  %v342_v11 = vld [vmem:[#allocation5 + $0x90] sm:$0xff]  ;;  %s249_s21 = scalar_lea.vmem [#allocation7], %s1160_s13  ;;  %s2142_s28 = scalar_lea.hbm %s2197_s4, %s1168_s22 }
  0x5d   : > { %v324_v5 = vld [vmem:[#allocation5] sm:$0xff]  ;;  %v325_v6 = vld [vmem:[#allocation5 + $0x8] sm:$0xff]  ;;  %v1493_v7 = vpack.c.bf16 %v373_v4, %v372_v2  ;;  %v343_v13 = vld [vmem:[#allocation5 + $0x98] sm:$0xff]  ;;  %s1055_s14 = sshll.u32 %s249_s21, 4  ;;  %s1040_s18 = scalar_lea.sflag [#allocation4], %s2045_s9  ;;  %s2144_s14 = int_to_ptr.vmem [resolvable:$true] %s1055_s14 }
  0x5e   : > { %v1463_v8 = vpack.c.bf16 %v325_v6, %v324_v5  ;;  %v356_v9 = vld [vmem:[#allocation5 + $0x100] sm:$0xff]  ;;  %v357_v10 = vld [vmem:[#allocation5 + $0x108] sm:$0xff]  ;;  %1462 = vmatprep.subr.bf16.mxu0 %v1461_v3  ;;  %v374_v14 = vld [vmem:[#allocation5 + $0x190] sm:$0xff]  ;;  %v1465_v16 = vpack.c.bf16 %v343_v13, %v342_v11  ;;  %s1777_s8 = scalar_lea.vmem %s2144_s14, 1024  ;;  %s1871_s29 = smov [#allocation7]  }
  0x5f   : > { %v1495_v12 = vpack.c.bf16 %v357_v10, %v356_v9  ;;  %v375_v15 = vld [vmem:[#allocation5 + $0x198] sm:$0xff]  ;;  %1494 = vmatprep.subr.bf16.mxu1 %v1493_v7  ;;  %v326_v18 = vld [vmem:[#allocation5 + $0x10] sm:$0xff]  ;;  %v344_v23 = vld [vmem:[#allocation5 + $0xa0] sm:$0xff]  ;;  %p1778_p4 = scmp.ne.s32.totalorder %s2144_s14, %s1777_s8  ;;  %s1781_s11 = sshll.u32 %s1871_s29, 4  ;;  %s1782_s11 = int_to_ptr.vmem [resolvable:$false] %s1781_s11 }
  0x60   : > { %1464 = vmatpush3.bf16.msra.mxu0 %v1463_v8  ;;  %v1497_v17 = vpack.c.bf16 %v375_v15, %v374_v14  ;;  %v327_v19 = vld [vmem:[#allocation5 + $0x18] sm:$0xff]  ;;  %v358_v20 = vld [vmem:[#allocation5 + $0x110] sm:$0xff]  ;;  %v345_v24 = vld [vmem:[#allocation5 + $0xa8] sm:$0xff]  ;;  %p1784_p12 = scmp.lt.s32.totalorder %s2144_s14, %s1782_s11 }
  0x61   : > { %1496 = vmatpush3.bf16.msra.mxu1 %v1495_v12  ;;  %v1467_v21 = vpack.c.bf16 %v327_v19, %v326_v18  ;;  %v359_v22 = vld [vmem:[#allocation5 + $0x118] sm:$0xff]  ;;  %1466 = vmatprep.subr.bf16.mxu0 %v1465_v16  ;;  %v1469_v26 = vpack.c.bf16 %v345_v24, %v344_v23  ;;  %v376_v27 = vld [vmem:[#allocation5 + $0x1a0] sm:$0xff]  ;;  %v377_v28 = vld [vmem:[#allocation5 + $0x1a8] sm:$0xff]  ;;  %p1779_p6 = pnand %p1778_p4, %p1991_p10 }
  0x62   : > { %1498 = vmatprep.subr.bf16.mxu1 %v1497_v17  ;;  %v1499_v25 = vpack.c.bf16 %v359_v22, %v358_v20  ;;  %v328_v29 = vld [vmem:[#allocation5 + $0x20] sm:$0xff]  ;;  %v1501_v30 = vpack.c.bf16 %v377_v28, %v376_v27  ;;  %v329_v31 = vld [vmem:[#allocation5 + $0x28] sm:$0xff]  ;;  %v346_v35 = vld [vmem:[#allocation5 + $0xb0] sm:$0xff] }
  0x63   : > { %v360_v32 = vld [vmem:[#allocation5 + $0x120] sm:$0xff]  ;;  %v361_v33 = vld [vmem:[#allocation5 + $0x128] sm:$0xff]  ;;  %v1471_v34 = vpack.c.bf16 %v329_v31, %v328_v29  ;;  %v347_v36 = vld [vmem:[#allocation5 + $0xb8] sm:$0xff]  ;;  %p1780_p8 = pneg %p1779_p6 }
  0x64   : > { %1468 = vmatpush3.bf16.msra.mxu0 %v1467_v21  ;;  %v378_v37 = vld [vmem:[#allocation5 + $0x1b0] sm:$0xff]  ;;  %v1503_v38 = vpack.c.bf16 %v361_v33, %v360_v32  ;;  %v1473_v39 = vpack.c.bf16 %v347_v36, %v346_v35  ;;  %v379_v40 = vld [vmem:[#allocation5 + $0x1b8] sm:$0xff]  ;;  %v348_v46 = vld [vmem:[#allocation5 + $0xc0] sm:$0xff] }
  0x65   : > { %1500 = vmatpush3.bf16.msra.mxu1 %v1499_v25  ;;  %1470 = vmatprep.subr.bf16.mxu0 %v1469_v26  ;;  %v330_v41 = vld [vmem:[#allocation5 + $0x30] sm:$0xff]  ;;  %v331_v42 = vld [vmem:[#allocation5 + $0x38] sm:$0xff]  ;;  %v1505_v43 = vpack.c.bf16 %v379_v40, %v378_v37  ;;  %v349_v47 = vld [vmem:[#allocation5 + $0xc8] sm:$0xff] }
  0x66   : > { %1502 = vmatprep.subr.bf16.mxu1 %v1501_v30  ;;  %v362_v44 = vld [vmem:[#allocation5 + $0x130] sm:$0xff]  ;;  %v363_v45 = vld [vmem:[#allocation5 + $0x138] sm:$0xff]  ;;  %v380_v48 = vld [vmem:[#allocation5 + $0x1c0] sm:$0xff]  ;;  %v1475_v50 = vpack.c.bf16 %v331_v42, %v330_v41  ;;  %v1477_v52 = vpack.c.bf16 %v349_v47, %v348_v46 }
  0x67   : > { %v381_v49 = vld [vmem:[#allocation5 + $0x1c8] sm:$0xff]  ;;  %v1507_v51 = vpack.c.bf16 %v363_v45, %v362_v44  ;;  %v332_v53 = vld [vmem:[#allocation5 + $0x40] sm:$0xff]  ;;  %v350_v58 = vld [vmem:[#allocation5 + $0xd0] sm:$0xff] }
  0x68   : > { %1472 = vmatpush3.bf16.msra.mxu0 %v1471_v34  ;;  %v333_v54 = vld [vmem:[#allocation5 + $0x48] sm:$0xff]  ;;  %v364_v55 = vld [vmem:[#allocation5 + $0x140] sm:$0xff]  ;;  %v1509_v56 = vpack.c.bf16 %v381_v49, %v380_v48  ;;  %v351_v59 = vld [vmem:[#allocation5 + $0xd8] sm:$0xff] }
  0x69   : > { %1504 = vmatpush3.bf16.msra.mxu1 %v1503_v38  ;;  %1474 = vmatprep.subr.bf16.mxu0 %v1473_v39  ;;  %v365_v57 = vld [vmem:[#allocation5 + $0x148] sm:$0xff]  ;;  %v382_v60 = vld [vmem:[#allocation5 + $0x1d0] sm:$0xff]  ;;  %v383_v61 = vld [vmem:[#allocation5 + $0x1d8] sm:$0xff]  ;;  %v1479_v62 = vpack.c.bf16 %v333_v54, %v332_v53  ;;  %v1481_v0 = vpack.c.bf16 %v351_v59, %v350_v58 }
  0x6a   : > { %1506 = vmatprep.subr.bf16.mxu1 %v1505_v43  ;;  %v1511_v63 = vpack.c.bf16 %v365_v57, %v364_v55  ;;  %v334_v1 = vld [vmem:[#allocation5 + $0x50] sm:$0xff]  ;;  %v335_v2 = vld [vmem:[#allocation5 + $0x58] sm:$0xff]  ;;  %v1513_v4 = vpack.c.bf16 %v383_v61, %v382_v60  ;;  %v352_v6 = vld [vmem:[#allocation5 + $0xe0] sm:$0xff] }
  0x6b   : > { %v366_v3 = vld [vmem:[#allocation5 + $0x150] sm:$0xff]  ;;  %v367_v5 = vld [vmem:[#allocation5 + $0x158] sm:$0xff]  ;;  %v353_v7 = vld [vmem:[#allocation5 + $0xe8] sm:$0xff]  ;;  %v1483_v10 = vpack.c.bf16 %v335_v2, %v334_v1 }
  0x6c   : > { %1476 = vmatpush3.bf16.msra.mxu0 %v1475_v50  ;;  %v384_v8 = vld [vmem:[#allocation5 + $0x1e0] sm:$0xff]  ;;  %v385_v9 = vld [vmem:[#allocation5 + $0x1e8] sm:$0xff]  ;;  %v1515_v13 = vpack.c.bf16 %v367_v5, %v366_v3  ;;  %v1485_v14 = vpack.c.bf16 %v353_v7, %v352_v6  ;;  %v255_v17 = vld [vmem:[%s2049_s30 + $0x18] sm:$0xff] }
  0x6d   : > { %1508 = vmatpush3.bf16.msra.mxu1 %v1507_v51  ;;  %1478 = vmatprep.subr.bf16.mxu0 %v1477_v52  ;;  %v336_v11 = vld [vmem:[#allocation5 + $0x60] sm:$0xff]  ;;  %v337_v12 = vld [vmem:[#allocation5 + $0x68] sm:$0xff]  ;;  %v1517_v18 = vpack.c.bf16 %v385_v9, %v384_v8  ;;  %v354_v20 = vld [vmem:[#allocation5 + $0xf0] sm:$0xff] }
  0x6e   : > { %1510 = vmatprep.subr.bf16.mxu1 %v1509_v56  ;;  %v368_v15 = vld [vmem:[#allocation5 + $0x160] sm:$0xff]  ;;  %v253_v16 = vld [vmem:[%s2049_s30 + $0x8] sm:$0xff]  ;;  %v355_v21 = vld [vmem:[#allocation5 + $0xf8] sm:$0xff]  ;;  %637 = vmatprep.mubr.f32.mxu1 %v255_v17  ;;  %v1487_v24 = vpack.c.bf16 %v337_v12, %v336_v11 }
  0x6f   : > { %v369_v19 = vld [vmem:[#allocation5 + $0x168] sm:$0xff]  ;;  %532 = vmatprep.mubr.f32.mxu0 %v253_v16  ;;  %v386_v22 = vld [vmem:[#allocation5 + $0x1f0] sm:$0xff]  ;;  %v387_v23 = vld [vmem:[#allocation5 + $0x1f8] sm:$0xff]  ;;  %v1489_v26 = vpack.c.bf16 %v355_v21, %v354_v20 }
  0x70   : > { %1480 = vmatpush3.bf16.msra.mxu0 %v1479_v62  ;;  %v1519_v25 = vpack.c.bf16 %v369_v19, %v368_v15  ;;  %v338_v27 = vld [vmem:[#allocation5 + $0x70] sm:$0xff]  ;;  %v339_v28 = vld [vmem:[#allocation5 + $0x78] sm:$0xff]  ;;  %v1521_v30 = vpack.c.bf16 %v387_v23, %v386_v22  ;;  %v404_v32 = vld [vmem:[#allocation5 + $0x280] sm:$0xff] }
  0x71   : > { %1512 = vmatpush3.bf16.msra.mxu1 %v1511_v63  ;;  %1482 = vmatprep.subr.bf16.mxu0 %v1481_v0  ;;  %v370_v29 = vld [vmem:[#allocation5 + $0x170] sm:$0xff]  ;;  %v371_v31 = vld [vmem:[#allocation5 + $0x178] sm:$0xff]  ;;  %v405_v33 = vld [vmem:[#allocation5 + $0x288] sm:$0xff]  ;;  %v1491_v36 = vpack.c.bf16 %v339_v28, %v338_v27 }
  0x72   : > { %1514 = vmatprep.subr.bf16.mxu1 %v1513_v4  ;;  %v436_v34 = vld [vmem:[#allocation5 + $0x380] sm:$0xff]  ;;  %v437_v35 = vld [vmem:[#allocation5 + $0x388] sm:$0xff]  ;;  %v1523_v37 = vpack.c.bf16 %v371_v31, %v370_v29  ;;  %v1525_v38 = vpack.c.bf16 %v405_v33, %v404_v32  ;;  %v406_v44 = vld [vmem:[#allocation5 + $0x290] sm:$0xff] }
  0x73   : > { %v388_v39 = vld [vmem:[#allocation5 + $0x200] sm:$0xff]  ;;  %v389_v40 = vld [vmem:[#allocation5 + $0x208] sm:$0xff]  ;;  %v1557_v41 = vpack.c.bf16 %v437_v35, %v436_v34  ;;  %v407_v45 = vld [vmem:[#allocation5 + $0x298] sm:$0xff] }
  0x74   : > { %1484 = vmatpush3.bf16.msra.mxu0 %v1483_v10  ;;  %v420_v42 = vld [vmem:[#allocation5 + $0x300] sm:$0xff]  ;;  %v421_v43 = vld [vmem:[#allocation5 + $0x308] sm:$0xff]  ;;  %v1527_v47 = vpack.c.bf16 %v389_v40, %v388_v39  ;;  %v438_v48 = vld [vmem:[#allocation5 + $0x390] sm:$0xff]  ;;  %v1529_v55 = vpack.c.bf16 %v407_v45, %v406_v44 }
  0x75   : > { %1516 = vmatpush3.bf16.msra.mxu1 %v1515_v13  ;;  %1486 = vmatprep.subr.bf16.mxu0 %v1485_v14  ;;  %v252_v46 = vld [vmem:[%s2049_s30] sm:$0xff]  ;;  %v439_v49 = vld [vmem:[#allocation5 + $0x398] sm:$0xff]  ;;  %v254_v50 = vld [vmem:[%s2049_s30 + $0x10] sm:$0xff]  ;;  %v1559_v51 = vpack.c.bf16 %v421_v43, %v420_v42 }
  0x76   : > { %1518 = vmatprep.subr.bf16.mxu1 %v1517_v18  ;;  %v390_v52 = vld [vmem:[#allocation5 + $0x210] sm:$0xff]  ;;  %v391_v53 = vld [vmem:[#allocation5 + $0x218] sm:$0xff]  ;;  %v264_v58 = vld [vmem:[%s2049_s30 + $0x60] sm:$0xff]  ;;  %v1561_v59 = vpack.c.bf16 %v439_v49, %v438_v48 }
  0x77   : > { %v262_v54 = vld [vmem:[%s2049_s30 + $0x50] sm:$0xff]  ;;  %v423_v57 = vld [vmem:[#allocation5 + $0x318] sm:$0xff]  ;;  %v408_v60 = vld [vmem:[#allocation5 + $0x2a0] sm:$0xff]  ;;  %v1531_v63 = vpack.c.bf16 %v391_v53, %v390_v52 }
  0x78   : > { %1488 = vmatpush3.bf16.msra.mxu0 %v1487_v24  ;;  %v422_v56 = vld [vmem:[#allocation5 + $0x310] sm:$0xff]  ;;  %v409_v61 = vld [vmem:[#allocation5 + $0x2a8] sm:$0xff]  ;;  %v440_v0 = vld [vmem:[#allocation5 + $0x3a0] sm:$0xff] }
  0x79   : > { %1520 = vmatpush3.bf16.msra.mxu1 %v1519_v25  ;;  %1490 = vmatprep.subr.bf16.mxu0 %v1489_v26  ;;  %v261_v62 = vld [vmem:[%s2049_s30 + $0x48] sm:$0xff]  ;;  %v263_v2 = vld [vmem:[%s2049_s30 + $0x58] sm:$0xff]  ;;  %v1563_v3 = vpack.c.bf16 %v423_v57, %v422_v56  ;;  %v392_v4 = vld [vmem:[#allocation5 + $0x220] sm:$0xff]  ;;  %v1533_v7 = vpack.c.bf16 %v409_v61, %v408_v60 }
  0x7a   : > { %1522 = vmatprep.subr.bf16.mxu1 %v1521_v30  ;;  %v441_v1 = vld [vmem:[#allocation5 + $0x3a8] sm:$0xff]  ;;  %v271_v6 = vld [vmem:[%s2049_s30 + $0x98] sm:$0xff]  ;;  %v424_v8 = vld [vmem:[#allocation5 + $0x320] sm:$0xff] }
  0x7b   : > { %v393_v5 = vld [vmem:[#allocation5 + $0x228] sm:$0xff]  ;;  %v1565_v11 = vpack.c.bf16 %v441_v1, %v440_v0  ;;  %v410_v12 = vld [vmem:[#allocation5 + $0x2b0] sm:$0xff]  ;;  %v411_v13 = vld [vmem:[#allocation5 + $0x2b8] sm:$0xff] }
  0x7c   : > { %1492 = vmatpush3.bf16.msra.mxu0 %v1491_v36  ;;  %v425_v9 = vld [vmem:[#allocation5 + $0x328] sm:$0xff]  ;;  %v270_v14 = vld [vmem:[%s2049_s30 + $0x90] sm:$0xff]  ;;  %v1535_v15 = vpack.c.bf16 %v393_v5, %v392_v4  ;;  %v443_v17 = vld [vmem:[#allocation5 + $0x3b8] sm:$0xff]  ;;  %v1537_v23 = vpack.c.bf16 %v411_v13, %v410_v12 }
  0x7d   : > { %1524 = vmatpush3.bf16.msra.mxu1 %v1523_v37  ;;  %1526 = vmatprep.subr.bf16.mxu0 %v1525_v38  ;;  %v273_v10 = vld [vmem:[%s2049_s30 + $0xa8] sm:$0xff]  ;;  %v442_v16 = vld [vmem:[#allocation5 + $0x3b0] sm:$0xff]  ;;  %v272_v18 = vld [vmem:[%s2049_s30 + $0xa0] sm:$0xff]  ;;  %v1567_v19 = vpack.c.bf16 %v425_v9, %v424_v8 }
  0x7e   : > { %1558 = vmatprep.subr.bf16.mxu1 %v1557_v41  ;;  %v394_v20 = vld [vmem:[#allocation5 + $0x230] sm:$0xff]  ;;  %v395_v21 = vld [vmem:[#allocation5 + $0x238] sm:$0xff]  ;;  %v280_v22 = vld [vmem:[%s2049_s30 + $0xe0] sm:$0xff]  ;;  %v1569_v27 = vpack.c.bf16 %v443_v17, %v442_v16 }
  0x7f   : > { %533 = vmatmul.mubr.f32.vlgmr.msra.gmra.mrb[0].mxu0 %v252_v46  ;;  %v426_v24 = vld [vmem:[#allocation5 + $0x330] sm:$0xff]  ;;  %v427_v25 = vld [vmem:[#allocation5 + $0x338] sm:$0xff]  ;;  %v412_v28 = vld [vmem:[#allocation5 + $0x2c0] sm:$0xff]  ;;  %v1539_v31 = vpack.c.bf16 %v395_v21, %v394_v20 }
  0x80   : > { %638 = vmatmul.mubr.f32.vlgmr.msra.gmra.mrb[0].mxu1 %v254_v50  ;;  %1528 = vmatpush3.bf16.msra.mxu0 %v1527_v47  ;;  %v282_v26 = vld [vmem:[%s2049_s30 + $0xf0] sm:$0xff]  ;;  %v413_v29 = vld [vmem:[#allocation5 + $0x2c8] sm:$0xff]  ;;  %v279_v30 = vld [vmem:[%s2049_s30 + $0xd8] sm:$0xff]  ;;  %v1571_v35 = vpack.c.bf16 %v427_v25, %v426_v24 }
  0x81   : > { %1560 = vmatpush3.bf16.msra.mxu1 %v1559_v51  ;;  %537 = vmatprep.mubr.f32.mxu0 %v262_v54  ;;  %v444_v32 = vld [vmem:[#allocation5 + $0x3c0] sm:$0xff]  ;;  %v445_v33 = vld [vmem:[#allocation5 + $0x3c8] sm:$0xff]  ;;  %v1541_v39 = vpack.c.bf16 %v413_v29, %v412_v28  ;;  %v291_v42 = vld [vmem:[%s2049_s30 + $0x138] sm:$0xff] }
  0x82   : > { %642 = vmatprep.mubr.f32.mxu1 %v264_v58  ;;  %1530 = vmatprep.subr.bf16.mxu0 %v1529_v55  ;;  %v281_v34 = vld [vmem:[%s2049_s30 + $0xe8] sm:$0xff]  ;;  %v396_v36 = vld [vmem:[#allocation5 + $0x240] sm:$0xff]  ;;  %v1573_v43 = vpack.c.bf16 %v445_v33, %v444_v32  ;;  %v414_v44 = vld [vmem:[#allocation5 + $0x2d0] sm:$0xff] }
  0x83   : > { %538 = vmatmul.mubr.f32.gmra.mrb[2].mxu0 %v261_v62  ;;  %1562 = vmatprep.subr.bf16.mxu1 %v1561_v59  ;;  %v397_v37 = vld [vmem:[#allocation5 + $0x248] sm:$0xff]  ;;  %v428_v40 = vld [vmem:[#allocation5 + $0x340] sm:$0xff]  ;;  %v415_v45 = vld [vmem:[#allocation5 + $0x2d8] sm:$0xff] }
  0x84   : > { %643 = vmatmul.mubr.f32.gmra.mrb[2].mxu1 %v263_v2  ;;  %1532 = vmatpush3.bf16.msra.mxu0 %v1531_v63  ;;  %v289_v38 = vld [vmem:[%s2049_s30 + $0x128] sm:$0xff]  ;;  %v288_v46 = vld [vmem:[%s2049_s30 + $0x120] sm:$0xff]  ;;  %v1543_v47 = vpack.c.bf16 %v397_v37, %v396_v36  ;;  %v446_v48 = vld [vmem:[#allocation5 + $0x3d0] sm:$0xff]  ;;  %v1545_v55 = vpack.c.bf16 %v415_v45, %v414_v44 }
  0x85   : > { %1564 = vmatpush3.bf16.msra.mxu1 %v1563_v3  ;;  %542 = vmatprep.mubr.f32.mxu0 %v271_v6  ;;  %v429_v41 = vld [vmem:[#allocation5 + $0x348] sm:$0xff]  ;;  %v447_v49 = vld [vmem:[#allocation5 + $0x3d8] sm:$0xff]  ;;  %v290_v50 = vld [vmem:[%s2049_s30 + $0x130] sm:$0xff] }
  0x86   : > { %647 = vmatprep.mubr.f32.mxu1 %v273_v10  ;;  %1534 = vmatprep.subr.bf16.mxu0 %v1533_v7  ;;  %v1575_v51 = vpack.c.bf16 %v429_v41, %v428_v40  ;;  %v398_v52 = vld [vmem:[#allocation5 + $0x250] sm:$0xff]  ;;  %v399_v53 = vld [vmem:[#allocation5 + $0x258] sm:$0xff]  ;;  %v300_v58 = vld [vmem:[%s2049_s30 + $0x180] sm:$0xff]  ;;  %v1577_v59 = vpack.c.bf16 %v447_v49, %v446_v48 }
  0x87   : > { %543 = vmatmul.mubr.f32.gmra.mrb[4].mxu0 %v270_v14  ;;  %1566 = vmatprep.subr.bf16.mxu1 %v1565_v11  ;;  %v298_v54 = vld [vmem:[%s2049_s30 + $0x170] sm:$0xff]  ;;  %v431_v57 = vld [vmem:[#allocation5 + $0x358] sm:$0xff]  ;;  %v416_v60 = vld [vmem:[#allocation5 + $0x2e0] sm:$0xff]  ;;  %v1547_v63 = vpack.c.bf16 %v399_v53, %v398_v52 }
  0x88   : > { %648 = vmatmul.mubr.f32.gmra.mrb[4].mxu1 %v272_v18  ;;  %1536 = vmatpush3.bf16.msra.mxu0 %v1535_v15  ;;  %v430_v56 = vld [vmem:[#allocation5 + $0x350] sm:$0xff]  ;;  %v417_v61 = vld [vmem:[#allocation5 + $0x2e8] sm:$0xff]  ;;  %v448_v0 = vld [vmem:[#allocation5 + $0x3e0] sm:$0xff] }
  0x89   : > { %1568 = vmatpush3.bf16.msra.mxu1 %v1567_v19  ;;  %547 = vmatprep.mubr.f32.mxu0 %v280_v22  ;;  %v297_v62 = vld [vmem:[%s2049_s30 + $0x168] sm:$0xff]  ;;  %v299_v2 = vld [vmem:[%s2049_s30 + $0x178] sm:$0xff]  ;;  %v1579_v3 = vpack.c.bf16 %v431_v57, %v430_v56  ;;  %v400_v4 = vld [vmem:[#allocation5 + $0x260] sm:$0xff]  ;;  %v1549_v7 = vpack.c.bf16 %v417_v61, %v416_v60 }
  0x8a   : > { %652 = vmatprep.mubr.f32.mxu1 %v282_v26  ;;  %1538 = vmatprep.subr.bf16.mxu0 %v1537_v23  ;;  %v449_v1 = vld [vmem:[#allocation5 + $0x3e8] sm:$0xff]  ;;  %v307_v6 = vld [vmem:[%s2049_s30 + $0x1b8] sm:$0xff]  ;;  %v432_v8 = vld [vmem:[#allocation5 + $0x360] sm:$0xff] }
  0x8b   : > { %548 = vmatmul.mubr.f32.gmra.mrb[6].mxu0 %v279_v30  ;;  %1570 = vmatprep.subr.bf16.mxu1 %v1569_v27  ;;  %v401_v5 = vld [vmem:[#allocation5 + $0x268] sm:$0xff]  ;;  %v1581_v11 = vpack.c.bf16 %v449_v1, %v448_v0  ;;  %v418_v12 = vld [vmem:[#allocation5 + $0x2f0] sm:$0xff]  ;;  %v419_v13 = vld [vmem:[#allocation5 + $0x2f8] sm:$0xff] }
  0x8c   : > { %653 = vmatmul.mubr.f32.gmra.mrb[6].mxu1 %v281_v34  ;;  %1540 = vmatpush3.bf16.msra.mxu0 %v1539_v31  ;;  %v433_v9 = vld [vmem:[#allocation5 + $0x368] sm:$0xff]  ;;  %v306_v14 = vld [vmem:[%s2049_s30 + $0x1b0] sm:$0xff]  ;;  %v1551_v15 = vpack.c.bf16 %v401_v5, %v400_v4  ;;  %v451_v17 = vld [vmem:[#allocation5 + $0x3f8] sm:$0xff]  ;;  %v1553_v23 = vpack.c.bf16 %v419_v13, %v418_v12 }
  0x8d   : > { %1572 = vmatpush3.bf16.msra.mxu1 %v1571_v35  ;;  %552 = vmatprep.mubr.f32.mxu0 %v289_v38  ;;  %v309_v10 = vld [vmem:[%s2049_s30 + $0x1c8] sm:$0xff]  ;;  %v450_v16 = vld [vmem:[#allocation5 + $0x3f0] sm:$0xff]  ;;  %v308_v18 = vld [vmem:[%s2049_s30 + $0x1c0] sm:$0xff]  ;;  %v1583_v19 = vpack.c.bf16 %v433_v9, %v432_v8 }
  0x8e   : > { %657 = vmatprep.mubr.f32.mxu1 %v291_v42  ;;  %1542 = vmatprep.subr.bf16.mxu0 %v1541_v39  ;;  %v402_v20 = vld [vmem:[#allocation5 + $0x270] sm:$0xff]  ;;  %v403_v21 = vld [vmem:[#allocation5 + $0x278] sm:$0xff]  ;;  %v316_v22 = vld [vmem:[%s2049_s30 + $0x200] sm:$0xff]  ;;  %v1585_v27 = vpack.c.bf16 %v451_v17, %v450_v16 }
  0x8f   : > { %553 = vmatmul.mubr.f32.gmra.mrb[8].mxu0 %v288_v46  ;;  %1574 = vmatprep.subr.bf16.mxu1 %v1573_v43  ;;  %v434_v24 = vld [vmem:[#allocation5 + $0x370] sm:$0xff]  ;;  %v435_v25 = vld [vmem:[#allocation5 + $0x378] sm:$0xff]  ;;  %v452_v28 = vld [vmem:[#allocation5 + $0x400] sm:$0xff]  ;;  %v1555_v31 = vpack.c.bf16 %v403_v21, %v402_v20 }
  0x90   : > { %658 = vmatmul.mubr.f32.gmra.mrb[8].mxu1 %v290_v50  ;;  %1544 = vmatpush3.bf16.msra.mxu0 %v1543_v47  ;;  %v318_v26 = vld [vmem:[%s2049_s30 + $0x210] sm:$0xff]  ;;  %v453_v29 = vld [vmem:[#allocation5 + $0x408] sm:$0xff]  ;;  %v315_v30 = vld [vmem:[%s2049_s30 + $0x1f8] sm:$0xff]  ;;  %v1587_v33 = vpack.c.bf16 %v435_v25, %v434_v24 }
  0x91   : > { %1576 = vmatpush3.bf16.msra.mxu1 %v1575_v51  ;;  %557 = vmatprep.mubr.f32.mxu0 %v298_v54  ;;  %v317_v32 = vld [vmem:[%s2049_s30 + $0x208] sm:$0xff]  ;;  %v1589_v35 = vpack.c.bf16 %v453_v29, %v452_v28  ;;  %v259_v36 = vld [vmem:[%s2049_s30 + $0x38] sm:$0xff]  ;;  %v454_v37 = vld [vmem:[#allocation5 + $0x410] sm:$0xff] }
  0x92   : > { %662 = vmatprep.mubr.f32.mxu1 %v300_v58  ;;  %1546 = vmatprep.subr.bf16.mxu0 %v1545_v55  ;;  %v257_v34 = vld [vmem:[%s2049_s30 + $0x28] sm:$0xff]  ;;  %v455_v38 = vld [vmem:[#allocation5 + $0x418] sm:$0xff]  ;;  %v256_v39 = vld [vmem:[%s2049_s30 + $0x20] sm:$0xff] }
  0x93   : > { %558 = vmatmul.mubr.f32.gmra.mrb[10].mxu0 %v297_v62  ;;  %1578 = vmatprep.subr.bf16.mxu1 %v1577_v59  ;;  %v258_v40 = vld [vmem:[%s2049_s30 + $0x30] sm:$0xff]  ;;  %v1593_v42 = vpack.c.bf16 %v455_v38, %v454_v37  ;;  %v268_v43 = vld [vmem:[%s2049_s30 + $0x80] sm:$0xff]  ;;  %v457_v45 = vld [vmem:[#allocation5 + $0x428] sm:$0xff] }
  0x94   : > { %663 = vmatmul.mubr.f32.gmra.mrb[10].mxu1 %v299_v2  ;;  %1548 = vmatpush3.bf16.msra.mxu0 %v1547_v63  ;;  %v266_v41 = vld [vmem:[%s2049_s30 + $0x70] sm:$0xff]  ;;  %v456_v44 = vld [vmem:[#allocation5 + $0x420] sm:$0xff]  ;;  %v265_v46 = vld [vmem:[%s2049_s30 + $0x68] sm:$0xff] }
  0x95   : > { %1580 = vmatpush3.bf16.msra.mxu1 %v1579_v3  ;;  %562 = vmatprep.mubr.f32.mxu0 %v307_v6  ;;  %v267_v47 = vld [vmem:[%s2049_s30 + $0x78] sm:$0xff]  ;;  %v1597_v49 = vpack.c.bf16 %v457_v45, %v456_v44  ;;  %v277_v50 = vld [vmem:[%s2049_s30 + $0xc8] sm:$0xff]  ;;  %v458_v51 = vld [vmem:[#allocation5 + $0x430] sm:$0xff] }
  0x96   : > { %667 = vmatprep.mubr.f32.mxu1 %v309_v10  ;;  %1550 = vmatprep.subr.bf16.mxu0 %v1549_v7  ;;  %v275_v48 = vld [vmem:[%s2049_s30 + $0xb8] sm:$0xff]  ;;  %v274_v53 = vld [vmem:[%s2049_s30 + $0xb0] sm:$0xff]  ;;  %v276_v54 = vld [vmem:[%s2049_s30 + $0xc0] sm:$0xff] }
  0x97   : > { %563 = vmatmul.mubr.f32.gmra.mrb[12].mxu0 %v306_v14  ;;  %1582 = vmatprep.subr.bf16.mxu1 %v1581_v11  ;;  %v459_v52 = vld [vmem:[#allocation5 + $0x438] sm:$0xff]  ;;  %v284_v55 = vld [vmem:[%s2049_s30 + $0x100] sm:$0xff]  ;;  %v286_v57 = vld [vmem:[%s2049_s30 + $0x110] sm:$0xff] }
  0x98   : > { %668 = vmatmul.mubr.f32.gmra.mrb[12].mxu1 %v308_v18  ;;  %1552 = vmatpush3.bf16.msra.mxu0 %v1551_v15  ;;  %v1601_v56 = vpack.c.bf16 %v459_v52, %v458_v51  ;;  %v460_v58 = vld [vmem:[#allocation5 + $0x440] sm:$0xff]  ;;  %v461_v59 = vld [vmem:[#allocation5 + $0x448] sm:$0xff]  ;;  %v283_v60 = vld [vmem:[%s2049_s30 + $0xf8] sm:$0xff] }
  0x99   : > { %1584 = vmatpush3.bf16.msra.mxu1 %v1583_v19  ;;  %567 = vmatprep.mubr.f32.mxu0 %v316_v22  ;;  %v285_v61 = vld [vmem:[%s2049_s30 + $0x108] sm:$0xff]  ;;  %v1605_v63 = vpack.c.bf16 %v461_v59, %v460_v58  ;;  %v295_v0 = vld [vmem:[%s2049_s30 + $0x158] sm:$0xff]  ;;  %v462_v1 = vld [vmem:[#allocation5 + $0x450] sm:$0xff] }
  0x9a   : > { %672 = vmatprep.mubr.f32.mxu1 %v318_v26  ;;  %1554 = vmatprep.subr.bf16.mxu0 %v1553_v23  ;;  %v293_v62 = vld [vmem:[%s2049_s30 + $0x148] sm:$0xff]  ;;  %v463_v2 = vld [vmem:[#allocation5 + $0x458] sm:$0xff]  ;;  %v292_v3 = vld [vmem:[%s2049_s30 + $0x140] sm:$0xff] }
  0x9b   : > { %568 = vmatmul.mubr.f32.gmra.mrb[14].mxu0 %v315_v30  ;;  %1586 = vmatprep.subr.bf16.mxu1 %v1585_v27  ;;  %v294_v4 = vld [vmem:[%s2049_s30 + $0x150] sm:$0xff]  ;;  %v1609_v6 = vpack.c.bf16 %v463_v2, %v462_v1  ;;  %v304_v7 = vld [vmem:[%s2049_s30 + $0x1a0] sm:$0xff]  ;;  %v465_v9 = vld [vmem:[#allocation5 + $0x468] sm:$0xff] }
  0x9c   : > { %673 = vmatmul.mubr.f32.gmra.mrb[14].mxu1 %v317_v32  ;;  %1556 = vmatpush3.bf16.msra.mxu0 %v1555_v31  ;;  %v302_v5 = vld [vmem:[%s2049_s30 + $0x190] sm:$0xff]  ;;  %v464_v8 = vld [vmem:[#allocation5 + $0x460] sm:$0xff]  ;;  %v301_v10 = vld [vmem:[%s2049_s30 + $0x188] sm:$0xff] }
  0x9d   : > { %1588 = vmatpush3.bf16.msra.mxu1 %v1587_v33  ;;  %742 = vmatprep.mubr.f32.mxu0 %v257_v34  ;;  %v303_v11 = vld [vmem:[%s2049_s30 + $0x198] sm:$0xff]  ;;  %v1613_v13 = vpack.c.bf16 %v465_v9, %v464_v8  ;;  %v313_v14 = vld [vmem:[%s2049_s30 + $0x1e8] sm:$0xff]  ;;  %v466_v15 = vld [vmem:[#allocation5 + $0x470] sm:$0xff] }
  0x9e   : > { %847 = vmatprep.mubr.f32.mxu1 %v259_v36  ;;  %1590 = vmatprep.subr.bf16.mxu0 %v1589_v35  ;;  %v311_v12 = vld [vmem:[%s2049_s30 + $0x1d8] sm:$0xff]  ;;  %v310_v17 = vld [vmem:[%s2049_s30 + $0x1d0] sm:$0xff]  ;;  %v312_v18 = vld [vmem:[%s2049_s30 + $0x1e0] sm:$0xff] }
  0x9f   : > { %743 = vmatmul.mubr.f32.vlgmr.msra.gmra.mrb[16].mxu0 %v256_v39  ;;  %1621 = vmatprep.subr.bf16.mxu1 %v1589_v35  ;;  %v467_v16 = vld [vmem:[#allocation5 + $0x478] sm:$0xff]  ;;  %v320_v19 = vld [vmem:[%s2049_s30 + $0x220] sm:$0xff]  ;;  %v322_v21 = vld [vmem:[%s2049_s30 + $0x230] sm:$0xff] }
  0xa0   : > { %848 = vmatmul.mubr.f32.vlgmr.msra.gmra.mrb[16].mxu1 %v258_v40  ;;  %1592 = vmatpush3.bf16.msra.mxu0 %v1589_v35  ;;  %v1617_v20 = vpack.c.bf16 %v467_v16, %v466_v15  ;;  %v319_v22 = vld [vmem:[%s2049_s30 + $0x218] sm:$0xff]  ;;  %v321_v23 = vld [vmem:[%s2049_s30 + $0x228] sm:$0xff]  ;;  %v260_v24 = vld [vmem:[%s2049_s30 + $0x40] sm:$0xff] }
  0xa1   : > { %1629 = vmatpush3.bf16.msra.mxu1 %v1589_v35  ;;  %747 = vmatprep.mubr.f32.mxu0 %v266_v41  ;;  %v296_v25 = vld [vmem:[%s2049_s30 + $0x160] sm:$0xff]  ;;  %v269_v26 = vld [vmem:[%s2049_s30 + $0x88] sm:$0xff]  ;;  %v278_v28 = vld [vmem:[%s2049_s30 + $0xd0] sm:$0xff] }
  0xa2   : > { %852 = vmatprep.mubr.f32.mxu1 %v268_v43  ;;  %1594 = vmatprep.subr.bf16.mxu0 %v1593_v42  ;;  %v305_v27 = vld [vmem:[%s2049_s30 + $0x1a8] sm:$0xff]  ;;  %v314_v29 = vld [vmem:[%s2049_s30 + $0x1f0] sm:$0xff]  ;;  %v287_v30 = vld [vmem:[%s2049_s30 + $0x118] sm:$0xff] }
  0xa3   : > { %748 = vmatmul.mubr.f32.gmra.mrb[18].mxu0 %v265_v46  ;;  %1622 = vmatprep.subr.bf16.mxu1 %v1593_v42  ;;  %v323_v31 = vld [vmem:[%s2049_s30 + $0x238] sm:$0xff]  ;;  %s1783_s30 = scalar_lea.vmem %s1782_s11, 2048 }
  0xa4   : > { %853 = vmatmul.mubr.f32.gmra.mrb[18].mxu1 %v267_v47  ;;  %1596 = vmatpush3.bf16.msra.mxu0 %v1593_v42  ;;  %p1785_p13 = scmp.lt.s32.totalorder %s1783_s30, %s1777_s8 }
  0xa5   : > { %1630 = vmatpush3.bf16.msra.mxu1 %v1593_v42  ;;  %752 = vmatprep.mubr.f32.mxu0 %v275_v48 }
  0xa6   : > { %857 = vmatprep.mubr.f32.mxu1 %v277_v50  ;;  %1598 = vmatprep.subr.bf16.mxu0 %v1597_v49  ;;  %p1786_p0 = por %p1785_p13, %p1784_p12 }
  0xa7   : > { %753 = vmatmul.mubr.f32.gmra.mrb[20].mxu0 %v274_v53  ;;  %1623 = vmatprep.subr.bf16.mxu1 %v1597_v49 }
  0xa8   : > { %858 = vmatmul.mubr.f32.gmra.mrb[20].mxu1 %v276_v54  ;;  %1600 = vmatpush3.bf16.msra.mxu0 %v1597_v49  ;;  %p1787_p5 = pnand %p1786_p0, %p1780_p8 }
  0xa9   : > { %1631 = vmatpush3.bf16.msra.mxu1 %v1597_v49  ;;  %757 = vmatprep.mubr.f32.mxu0 %v284_v55 }
  0xaa   : > { %862 = vmatprep.mubr.f32.mxu1 %v286_v57  ;;  %1602 = vmatprep.subr.bf16.mxu0 %v1601_v56 }
  0xab   : > { %758 = vmatmul.mubr.f32.gmra.mrb[22].mxu0 %v283_v60  ;;  %1624 = vmatprep.subr.bf16.mxu1 %v1601_v56 }
  0xac   : > { %863 = vmatmul.mubr.f32.gmra.mrb[22].mxu1 %v285_v61  ;;  %1604 = vmatpush3.bf16.msra.mxu0 %v1601_v56 }
  0xad   : > { %1632 = vmatpush3.bf16.msra.mxu1 %v1601_v56  ;;  %762 = vmatprep.mubr.f32.mxu0 %v293_v62 }
  0xae   : > { %867 = vmatprep.mubr.f32.mxu1 %v295_v0  ;;  %1606 = vmatprep.subr.bf16.mxu0 %v1605_v63 }
  0xaf   : > { %763 = vmatmul.mubr.f32.gmra.mrb[24].mxu0 %v292_v3  ;;  %1625 = vmatprep.subr.bf16.mxu1 %v1605_v63 }
  0xb0   : > { %868 = vmatmul.mubr.f32.gmra.mrb[24].mxu1 %v294_v4  ;;  %1608 = vmatpush3.bf16.msra.mxu0 %v1605_v63 }
  0xb1   : > { %1633 = vmatpush3.bf16.msra.mxu1 %v1605_v63  ;;  %767 = vmatprep.mubr.f32.mxu0 %v302_v5 }
  0xb2   : > { %872 = vmatprep.mubr.f32.mxu1 %v304_v7  ;;  %1610 = vmatprep.subr.bf16.mxu0 %v1609_v6 }
  0xb3   : > { %768 = vmatmul.mubr.f32.gmra.mrb[26].mxu0 %v301_v10  ;;  %1626 = vmatprep.subr.bf16.mxu1 %v1609_v6 }
  0xb4   : > { %873 = vmatmul.mubr.f32.gmra.mrb[26].mxu1 %v303_v11  ;;  %1612 = vmatpush3.bf16.msra.mxu0 %v1609_v6 }
  0xb5   : > { %1634 = vmatpush3.bf16.msra.mxu1 %v1609_v6  ;;  %772 = vmatprep.mubr.f32.mxu0 %v311_v12 }
  0xb6   : > { %877 = vmatprep.mubr.f32.mxu1 %v313_v14  ;;  %1614 = vmatprep.subr.bf16.mxu0 %v1613_v13 }
  0xb7   : > { %773 = vmatmul.mubr.f32.gmra.mrb[28].mxu0 %v310_v17  ;;  %1627 = vmatprep.subr.bf16.mxu1 %v1613_v13 }
  0xb8   : > { %878 = vmatmul.mubr.f32.gmra.mrb[28].mxu1 %v312_v18  ;;  %1616 = vmatpush3.bf16.msra.mxu0 %v1613_v13 }
  0xb9   : > { %1635 = vmatpush3.bf16.msra.mxu1 %v1613_v13  ;;  %777 = vmatprep.mubr.f32.mxu0 %v320_v19 }
  0xba   : > { %882 = vmatprep.mubr.f32.mxu1 %v322_v21  ;;  %1618 = vmatprep.subr.bf16.mxu0 %v1617_v20 }
  0xbb   : > { %778 = vmatmul.mubr.f32.gmra.mrb[30].mxu0 %v319_v22  ;;  %1628 = vmatprep.subr.bf16.mxu1 %v1617_v20 }
  0xbc   : > { %883 = vmatmul.mubr.f32.gmra.mrb[30].mxu1 %v321_v23  ;;  %1620 = vmatpush3.bf16.msra.mxu0 %v1617_v20 }
  0xbd   : > { %1636 = vmatpush3.bf16.msra.mxu1 %v1617_v20  ;;  %1449 = vmatprep.mubr.f32.mxu0 %v260_v24 }
  0xbe   : > { %1455 = vmatprep.mubr.f32.mxu1 %v296_v25 }
  0xbf   : > { %1450 = vmatmul.mubr.f32.vlgmr.msra.gmra.mrb[32].mxu0 %v269_v26 }
  0xc0   : > { %1456 = vmatmul.mubr.f32.vlgmr.msra.gmra.mrb[32].mxu1 %v305_v27  ;;  %1452 = vmatprep.mubr.f32.mxu0 %v278_v28 }
  0xc1   : > { %1458 = vmatprep.mubr.f32.mxu1 %v314_v29 }
  0xc3   : > { %1453 = vmatmul.mubr.f32.gmra.mrb[34].mxu0 %v287_v30 }
  0xc4   : > { %1459 = vmatmul.mubr.f32.gmra.mrb[34].mxu1 %v323_v31 }
 0x152   : > { %v1201_v32 = vpop.f32.mrb[0].mxu0 }
 0x153   : > { %v1257_v33 = vpop.f32.mrb[0].mxu1  ;;  %v1202_v34 = vpop.f32.mrb[1].mxu0 }
 0x154   : > { %v1203_v35 = vadd.f32 %v1202_v34, %v1201_v32  ;;  %v1258_v36 = vpop.f32.mrb[1].mxu1 }
 0x155   : > { %v1259_v37 = vadd.f32 %v1258_v36, %v1257_v33 }
 0x156   : > { %v1204_v38 = vpop.f32.mrb[2].mxu0 }
 0x157   : > { %v640_v39 = vadd.f32 %v1259_v37, %v1203_v35  ;;  %v1260_v40 = vpop.f32.mrb[2].mxu1  ;;  %v1205_v41 = vpop.f32.mrb[3].mxu0 }
 0x158   : > { %v1206_v42 = vadd.f32 %v1205_v41, %v1204_v38  ;;  %v1261_v43 = vpop.f32.mrb[3].mxu1 }
 0x159   : > { %v1262_v44 = vadd.f32 %v1261_v43, %v1260_v40 }
 0x15a   : > { %v1207_v45 = vpop.f32.mrb[4].mxu0 }
 0x15b   : > { %v645_v46 = vadd.f32 %v1262_v44, %v1206_v42  ;;  %v1263_v47 = vpop.f32.mrb[4].mxu1  ;;  %v1208_v48 = vpop.f32.mrb[5].mxu0 }
 0x15c   : > { %v1209_v49 = vadd.f32 %v1208_v48, %v1207_v45  ;;  %v1264_v50 = vpop.f32.mrb[5].mxu1 }
 0x15d   : > { %v1265_v51 = vadd.f32 %v1264_v50, %v1263_v47 }
 0x15e   : > { %v1210_v52 = vpop.f32.mrb[6].mxu0 }
 0x15f   : > { %v650_v53 = vadd.f32 %v1265_v51, %v1209_v49  ;;  %v1266_v54 = vpop.f32.mrb[6].mxu1  ;;  %v1211_v55 = vpop.f32.mrb[7].mxu0 }
 0x160   : > { %v1212_v56 = vadd.f32 %v1211_v55, %v1210_v52  ;;  %v1267_v57 = vpop.f32.mrb[7].mxu1 }
 0x161   : > { %v1268_v58 = vadd.f32 %v1267_v57, %v1266_v54 }
 0x162   : > { %v1213_v59 = vpop.f32.mrb[8].mxu0 }
 0x163   : > { %v655_v60 = vadd.f32 %v1268_v58, %v1212_v56  ;;  %v1269_v61 = vpop.f32.mrb[8].mxu1  ;;  %v1214_v62 = vpop.f32.mrb[9].mxu0 }
 0x164   : > { %v1215_v63 = vadd.f32 %v1214_v62, %v1213_v59  ;;  %v1270_v0 = vpop.f32.mrb[9].mxu1 }
 0x165   : > { %v1271_v1 = vadd.f32 %v1270_v0, %v1269_v61 }
 0x166   : > { %v1216_v2 = vpop.f32.mrb[10].mxu0 }
 0x167   : > { %v660_v3 = vadd.f32 %v1271_v1, %v1215_v63  ;;  %v1272_v4 = vpop.f32.mrb[10].mxu1  ;;  %v1217_v5 = vpop.f32.mrb[11].mxu0 }
 0x168   : > { %v1218_v6 = vadd.f32 %v1217_v5, %v1216_v2  ;;  %v1273_v7 = vpop.f32.mrb[11].mxu1 }
 0x169   : > { %v1274_v8 = vadd.f32 %v1273_v7, %v1272_v4 }
 0x16a   : > { %v1219_v9 = vpop.f32.mrb[12].mxu0 }
 0x16b   : > { %v665_v10 = vadd.f32 %v1274_v8, %v1218_v6  ;;  %v1275_v11 = vpop.f32.mrb[12].mxu1  ;;  %v1220_v12 = vpop.f32.mrb[13].mxu0 }
 0x16c   : > { %v1221_v13 = vadd.f32 %v1220_v12, %v1219_v9  ;;  %v1276_v14 = vpop.f32.mrb[13].mxu1 }
 0x16d   : > { %v1277_v15 = vadd.f32 %v1276_v14, %v1275_v11 }
 0x16e   : > { %v1222_v16 = vpop.f32.mrb[14].mxu0 }
 0x16f   : > { %v670_v17 = vadd.f32 %v1277_v15, %v1221_v13  ;;  %v1278_v18 = vpop.f32.mrb[14].mxu1  ;;  %v1223_v19 = vpop.f32.mrb[15].mxu0 }
 0x170   : > { %v1224_v20 = vadd.f32 %v1223_v19, %v1222_v16  ;;  %v1279_v21 = vpop.f32.mrb[15].mxu1 }
 0x171   : > { %v1280_v22 = vadd.f32 %v1279_v21, %v1278_v18 }
 0x172   : > { %v1313_v23 = vpop.f32.mrb[16].mxu0 }
 0x173   : > { %v675_v24 = vadd.f32 %v1280_v22, %v1224_v20  ;;  %v1369_v25 = vpop.f32.mrb[16].mxu1  ;;  %v1314_v26 = vpop.f32.mrb[17].mxu0 }
 0x174   : > { %v1315_v27 = vadd.f32 %v1314_v26, %v1313_v23  ;;  %v1370_v28 = vpop.f32.mrb[17].mxu1 }
 0x175   : > { %v1371_v29 = vadd.f32 %v1370_v28, %v1369_v25 }
 0x176   : > { %v745_v30 = vadd.f32 %v1315_v27, %v640_v39  ;;  %v1316_v31 = vpop.f32.mrb[18].mxu0 }
 0x177   : > { %v1372_v32 = vpop.f32.mrb[18].mxu1  ;;  %v1317_v33 = vpop.f32.mrb[19].mxu0 }
 0x178   : > { %v1318_v34 = vadd.f32 %v1317_v33, %v1316_v31  ;;  %v1373_v35 = vpop.f32.mrb[19].mxu1  ;;  %v850_v36 = vadd.f32 %v1371_v29, %v745_v30 }
 0x179   : > { %v1374_v37 = vadd.f32 %v1373_v35, %v1372_v32 }
 0x17a   : > { %v750_v38 = vadd.f32 %v1318_v34, %v645_v46  ;;  %v1319_v40 = vpop.f32.mrb[20].mxu0 }
 0x17b   : > { %v1375_v41 = vpop.f32.mrb[20].mxu1  ;;  %v1320_v42 = vpop.f32.mrb[21].mxu0 }
 0x17c   : > { %v1321_v43 = vadd.f32 %v1320_v42, %v1319_v40  ;;  %v1376_v44 = vpop.f32.mrb[21].mxu1  ;;  %v855_v45 = vadd.f32 %v1374_v37, %v750_v38 }
 0x17d   : > { %v1377_v47 = vadd.f32 %v1376_v44, %v1375_v41 }
 0x17e   : > { %v755_v48 = vadd.f32 %v1321_v43, %v650_v53  ;;  %v1322_v49 = vpop.f32.mrb[22].mxu0 }
 0x17f   : > { %v1378_v50 = vpop.f32.mrb[22].mxu1  ;;  %v1323_v51 = vpop.f32.mrb[23].mxu0 }
 0x180   : > { %v1324_v39 = vadd.f32 %v1323_v51, %v1322_v49  ;;  %v1379_v52 = vpop.f32.mrb[23].mxu1  ;;  %v860_v54 = vadd.f32 %v1377_v47, %v755_v48 }
 0x181   : > { %v1380_v55 = vadd.f32 %v1379_v52, %v1378_v50 }
 0x182   : > { %v760_v56 = vadd.f32 %v1324_v39, %v655_v60  ;;  %v1325_v57 = vpop.f32.mrb[24].mxu0 }
 0x183   : > { %v1381_v58 = vpop.f32.mrb[24].mxu1  ;;  %v1326_v59 = vpop.f32.mrb[25].mxu0 }
 0x184   : > { %v1327_v46 = vadd.f32 %v1326_v59, %v1325_v57  ;;  %v1382_v61 = vpop.f32.mrb[25].mxu1  ;;  %v865_v62 = vadd.f32 %v1380_v55, %v760_v56 }
 0x185   : > { %v1383_v63 = vadd.f32 %v1382_v61, %v1381_v58 }
 0x186   : > { %v765_v0 = vadd.f32 %v1327_v46, %v660_v3  ;;  %v1328_v1 = vpop.f32.mrb[26].mxu0 }
 0x187   : > { %v1384_v2 = vpop.f32.mrb[26].mxu1  ;;  %v1329_v4 = vpop.f32.mrb[27].mxu0 }
 0x188   : > { %v1330_v53 = vadd.f32 %v1329_v4, %v1328_v1  ;;  %v1385_v5 = vpop.f32.mrb[27].mxu1  ;;  %v870_v6 = vadd.f32 %v1383_v63, %v765_v0 }
 0x189   : > { %v1386_v7 = vadd.f32 %v1385_v5, %v1384_v2 }
 0x18a   : > { %v770_v8 = vadd.f32 %v1330_v53, %v665_v10  ;;  %v1331_v9 = vpop.f32.mrb[28].mxu0  ;;  %v1161_v10 = vld [vmem:[%s2195_s2] ss:$0 sm:$0xff] }
 0x18b   : > { %v1387_v11 = vpop.f32.mrb[28].mxu1  ;;  %v1332_v12 = vpop.f32.mrb[29].mxu0 }
 0x18c   : > { %v1333_v60 = vadd.f32 %v1332_v12, %v1331_v9  ;;  %v1388_v13 = vpop.f32.mrb[29].mxu1  ;;  %v875_v14 = vadd.f32 %v1386_v7, %v770_v8 }
 0x18d   : > { %v1389_v15 = vadd.f32 %v1388_v13, %v1387_v11 }
 0x18e   : > { %v775_v16 = vadd.f32 %v1333_v60, %v670_v17  ;;  %v1334_v18 = vpop.f32.mrb[30].mxu0  ;;  %v1162_v17 = vld [vmem:[%s2196_s3] ss:$0 sm:$0xff] }
 0x18f   : > { %v1390_v19 = vpop.f32.mrb[30].mxu1  ;;  %v1335_v20 = vpop.f32.mrb[31].mxu0 }
 0x190   : > { %v1336_v3 = vadd.f32 %v1335_v20, %v1334_v18  ;;  %v1391_v21 = vpop.f32.mrb[31].mxu1  ;;  %v880_v22 = vadd.f32 %v1389_v15, %v775_v16 }
 0x191   : > { %v1392_v23 = vadd.f32 %v1391_v21, %v1390_v19 }
 0x192   : > { %v780_v25 = vadd.f32 %v1336_v3, %v675_v24  ;;  %v1451_v26 = vpop.f32.mrb[32].mxu0 }
 0x193   : > { %v960_v27 = vadd.f32 %v1451_v26, %v855_v45  ;;  %v1457_v28 = vpop.f32.mrb[32].mxu1  ;;  %v954_v29 = vpop.f32.mrb[33].mxu0 }
 0x194   : > { %v980_v30 = vadd.f32 %v1457_v28, %v875_v14  ;;  %v955_v31 = vadd.f32 %v954_v29, %v850_v36  ;;  %v974_v32 = vpop.f32.mrb[33].mxu1  ;;  %v885_v33 = vadd.f32 %v1392_v23, %v780_v25 }
 0x195   : > { %v1001_v34 = vmul.f32 %v1161_v10, %v960_v27  ;;  %v975_v35 = vadd.f32 %v974_v32, %v870_v6 }
 0x196   : > { %v1005_v24 = vmul.f32 %v1161_v10, %v980_v30  ;;  %v1000_v37 = vmul.f32 %v1161_v10, %v955_v31  ;;  %v1454_v38 = vpop.f32.mrb[34].mxu0 }
 0x197   : > { %v1016_v40 = vadd.f32 %v1162_v17, %v1001_v34  ;;  %v1004_v41 = vmul.f32 %v1161_v10, %v975_v35  ;;  %v970_v42 = vadd.f32 %v1454_v38, %v865_v62  ;;  %v1460_v43 = vpop.f32.mrb[34].mxu1  ;;  %v964_v44 = vpop.f32.mrb[35].mxu0 }
 0x198   : > { %v1020_v45 = vadd.f32 %v1162_v17, %v1005_v24  ;;  %v1015_v47 = vadd.f32 %v1162_v17, %v1000_v37  ;;  %v990_v48 = vadd.f32 %v1460_v43, %v885_v33  ;;  %v965_v49 = vadd.f32 %v964_v44, %v860_v54  ;;  %v984_v50 = vpop.f32.mrb[35].mxu1 }
 0x199   : > { %v1024_v36 = vmax.f32 %v1016_v40, 0.0  ;;  %v1019_v51 = vadd.f32 %v1162_v17, %v1004_v41  ;;  %v1003_v39 = vmul.f32 %v1161_v10, %v970_v42  ;;  %v985_v52 = vadd.f32 %v984_v50, %v880_v22 }
 0x19a   : > { %v1028_v55 = vmax.f32 %v1020_v45, 0.0  ;;  %v1023_v56 = vmax.f32 %v1015_v47, 0.0  ;;  %v1007_v57 = vmul.f32 %v1161_v10, %v990_v48  ;;  %v1002_v58 = vmul.f32 %v1161_v10, %v965_v49 }
 0x19b   : > { %1032 = vst [vmem:[%s249_s21 + $0x8] sm:$0xff] %v1024_v36  ;;  %v1027_v59 = vmax.f32 %v1019_v51, 0.0  ;;  %v1018_v46 = vadd.f32 %v1162_v17, %v1003_v39  ;;  %v1006_v61 = vmul.f32 %v1161_v10, %v985_v52 }
 0x19c   : > { %1036 = vst [vmem:[%s249_s21 + $0x28] sm:$0xff] %v1028_v55  ;;  %1031 = vst [vmem:[%s249_s21] sm:$0xff] %v1023_v56  ;;  %v1022_v54 = vadd.f32 %v1162_v17, %v1007_v57  ;;  %v1017_v62 = vadd.f32 %v1162_v17, %v1002_v58 }
 0x19d   : > { %1035 = vst [vmem:[%s249_s21 + $0x20] sm:$0xff] %v1027_v59  ;;  %v1026_v63 = vmax.f32 %v1018_v46, 0.0  ;;  %v1021_v0 = vadd.f32 %v1162_v17, %v1006_v61 }
 0x19e   : > { %v1030_v1 = vmax.f32 %v1022_v54, 0.0  ;;  %v1025_v2 = vmax.f32 %v1017_v62, 0.0 }
 0x19f   : > { %1034 = vst [vmem:[%s249_s21 + $0x18] sm:$0xff] %v1026_v63  ;;  %v1029_v4 = vmax.f32 %v1021_v0, 0.0 }
 0x1a0   : > { %1038 = vst [vmem:[%s249_s21 + $0x38] sm:$0xff] %v1030_v1  ;;  %1033 = vst [vmem:[%s249_s21 + $0x10] sm:$0xff] %v1025_v2 }
 0x1a1   : > { %1037 = vst [vmem:[%s249_s21 + $0x30] sm:$0xff] %v1029_v4 }
 0x1a2   : > { %1790 = shalt.err (!%p1787_p5)
}
 0x1a3   : > { %s1791_s23 = scalar_lea.hbm %s2142_s28, 1024  ;;  %s1795_s12 = scalar_lea.hbm %s2197_s4, 2048 }
 0x1a4   : > { %p1792_p9 = scmp.ne.s32.totalorder %s2142_s28, %s1791_s23  ;;  %p1796_p3 = scmp.lt.u32.totalorder %s2142_s28, %s2197_s4 }
 0x1a5   : > { %p1797_p7 = scmp.lt.u32.totalorder %s1795_s12, %s1791_s23  ;;  %p1799_p4 = scmp.lt.u32.totalorder %s1791_s23, %s2142_s28 }
 0x1a6   : > { %p1793_p1 = pnand %p1792_p9, %p1991_p10 }
 0x1a7   : > { %p1798_p11 = por %p1797_p7, %p1796_p3 }
 0x1a8   : > { %p1794_p2 = pneg %p1793_p1 }
 0x1a9   : > { %p1800_p6 = por %p1799_p4, %p1798_p11 }
 0x1ab   : > { %p1801_p8 = pnand %p1800_p6, %p1794_p2 }
 0x1ad   : > { %1804 = shalt.err (!%p1801_p8)
}
 0x1ae   : > { %s1872_s22 = smov 128   ;;  %s1873_s24 = smov 8  }
 0x1af   : > { %1646 = dma.vmem_to_hbm [thread:$0]  (%p1991_p10), %s2144_s14, 1024, %s2142_s28, %s1040_s18, %s1872_s22, %s1872_s22, %s1873_s24  }
 0x1b0 PF: > { %s1070_s6 = sand.u32 1, %s1843_s15   ;;  %p2214_p12 = scmp.ne.s32.totalorder %s2205_s26, 0 }
 0x1b1   : > { %p2215_p13 = scmp.ge.s32.totalorder %s1863_s20, 2  ;;  %s1071_s8 = scalar_lea.sflag [#allocation4], %s1070_s6 }
 0x1b3   : > { %p1657_p0 = pnand %p2215_p13, %p2214_p12 }
 0x1b5   : > { %1838 = dma.done.wait (!%p1657_p0), %s1071_s8, 1024  }
 0x1b6   : > { %1840 = vsyncadd (!%p1657_p0), %s1071_s8, 4294966272  ;;  %s21_s20 = sadd.s32 1, %s1863_s20   ;;  %s2216_s15 = smov %s1847_s16 }
 0x1b7   : > { %p18_p5 = scmp.ge.s32.totalorder %s21_s20, 4   ;;  %s2217_s16 = smov %s1851_s17 }
 0x1b8   : > { %s2218_s17 = smov %s2000_s10  ;;  %s2219_s18 = smov %s1859_s19 }
 0x1b9   : > { %s2220_s19 = smov %s2222_s5  ;;  %20 = sbr.rel (!%p18_p5) target bundleno = 7 (0x7), region = 85 }
 0x1c0   :  { %1076 = vsyncpa [#allocation3], 1 }
 0x1c1   :  { %1078 = vsyncpa [#allocation3 + $0x1], 1 }
 0x1c2   :  { %1079 = vsyncpa [#allocation6], 1 }
 0x1c3   :  { %1080 = vsyncpa [#allocation4], 1 }
 0x1c4   :  { %1082 = vsyncpa [#allocation4 + $0x1], 1 }

</bundles_post_ra>
